<compile_context>
chip_gen: v6e
topology: v6e:2x2x1
jax: 0.10.0
libtpu: 0.0.40
codegen_flags: <defaults>
</compile_context>

<pallas_src>
import functools

import jax
import jax.numpy as jnp
from jax import lax
from jax.experimental import pallas as pl
from jax.experimental.pallas import tpu as pltpu


def _lstm_kernel(x_ref, wih_t_ref, whh_t_ref, bias_ref,
                 out_ref, hn_ref, cn_ref, *, T, B, H):
    """Fused single-call LSTM forward.

    x_ref:     (T*B, D)  flattened input sequence, VMEM
    wih_t_ref: (D, 4H)   W_ih^T (pre-transposed once, wrapper-side), VMEM
    whh_t_ref: (H, 4H)   W_hh^T (pre-transposed once, wrapper-side), VMEM
    bias_ref:  (1, 4H)   folded b_ih + b_hh, VMEM
    out_ref:   (T, B, H) all hidden states
    hn_ref:    (1, B, H) final hidden state
    cn_ref:    (1, B, H) final cell state
    """
    # Prologue: hoisted input projection — one MXU matmul for the whole
    # sequence, fully off the recurrent critical path.
    xg = jnp.dot(x_ref[...], wih_t_ref[...],
                 preferred_element_type=jnp.float32) + bias_ref[...]

    whh = whh_t_ref[...]                      # loaded once, reused every step
    h = jnp.zeros((B, H), jnp.float32)
    c = jnp.zeros((B, H), jnp.float32)
    hs = []

    # T is tiny and static: fully unroll so the only serial work per step is
    # one (B, H) @ (H, 4H) MXU matmul plus the pointwise cell update.
    for t in range(T):
        gates = xg[t * B:(t + 1) * B, :] + jnp.dot(
            h, whh, preferred_element_type=jnp.float32)
        # PyTorch gate order [i, f, g, o]. Sigmoid full-width (covers i/f/o,
        # one padded vreg of EUP work); tanh only on the g slice.
        sig = jax.nn.sigmoid(gates)
        i_g = sig[:, 0 * H:1 * H]
        f_g = sig[:, 1 * H:2 * H]
        o_g = sig[:, 3 * H:4 * H]
        g_g = jnp.tanh(gates[:, 2 * H:3 * H])

        c = f_g * c + i_g * g_g
        h = o_g * jnp.tanh(c)
        hs.append(h)

    out_ref[...] = jnp.stack(hs, axis=0)      # single write-back after loop
    hn_ref[0] = h
    cn_ref[0] = c


@jax.jit
def lstm_forward(x, wih_t, whh_t, bias):
    """x: (T, B, D) f32. wih_t: (D, 4H) = W_ih^T, whh_t: (H, 4H) = W_hh^T,
       bias: (1, 4H) = b_ih + b_hh (all prepared once, outside this call).
       Returns (output (T,B,H), (h_n (1,B,H), c_n (1,B,H)))."""
    T, B, D = x.shape
    H = whh_t.shape[0]

    kernel = functools.partial(_lstm_kernel, T=T, B=B, H=H)
    out, h_n, c_n = pl.pallas_call(
        kernel,
        out_shape=(
            jax.ShapeDtypeStruct((T, B, H), jnp.float32),   # all hidden states
            jax.ShapeDtypeStruct((1, B, H), jnp.float32),   # h_n
            jax.ShapeDtypeStruct((1, B, H), jnp.float32),   # c_n
        ),
        in_specs=[pl.BlockSpec(memory_space=pltpu.MemorySpace.VMEM)] * 4,
        out_specs=(
            pl.BlockSpec(memory_space=pltpu.MemorySpace.VMEM),
            pl.BlockSpec(memory_space=pltpu.MemorySpace.VMEM),
            pl.BlockSpec(memory_space=pltpu.MemorySpace.VMEM),
        ),
    )(x.reshape(T * B, D), wih_t, whh_t, bias)

    return out, (h_n, c_n)


def lstm_reference(x, w_ih, w_hh, b_ih, b_hh):
    """Pure-JAX reference (matches torch.nn.LSTM single layer), full f32
    matmul precision so it agrees with the Mosaic f32 matmuls to 1e-5."""
    T, B, D = x.shape
    H = w_hh.shape[1]
    hp = lax.Precision.HIGHEST

    def step(carry, x_t):
        h, c = carry
        gates = (jnp.dot(x_t, w_ih.T, precision=hp)
                 + jnp.dot(h, w_hh.T, precision=hp) + b_ih + b_hh)
        i = jax.nn.sigmoid(gates[:, 0 * H:1 * H])
        f = jax.nn.sigmoid(gates[:, 1 * H:2 * H])
        g = jnp.tanh(gates[:, 2 * H:3 * H])
        o = jax.nn.sigmoid(gates[:, 3 * H:4 * H])
        c_new = f * c + i * g
        h_new = o * jnp.tanh(c_new)
        return (h_new, c_new), h_new

    h0 = jnp.zeros((B, H), jnp.float32)
    c0 = jnp.zeros((B, H), jnp.float32)
    (h_n, c_n), out = lax.scan(step, (h0, c0), x)
    return out, (h_n[None], c_n[None])


if __name__ == "__main__":
    # Module config: input_dim=16, hidden_dim=32, lstm_layers=1, bias=True,
    # batch_first=False, bidirectional=False, proj_size=0
    T, B, D, H = 8, 2, 16, 32

    key = jax.random.PRNGKey(0)
    kx, k1, k2, k3, k4 = jax.random.split(key, 5)
    bound = 1.0 / jnp.sqrt(H)

    x = jax.random.normal(kx, (T, B, D), jnp.float32)
    w_ih = jax.random.uniform(k1, (4 * H, D), jnp.float32, -bound, bound)
    w_hh = jax.random.uniform(k2, (4 * H, H), jnp.float32, -bound, bound)
    b_ih = jax.random.uniform(k3, (4 * H,), jnp.float32, -bound, bound)
    b_hh = jax.random.uniform(k4, (4 * H,), jnp.float32, -bound, bound)

    # One-time parameter prep (hoisted out of the per-call path): transposes
    # for lane-major matmul RHS layout and folded bias.
    wih_t = jnp.transpose(w_ih)               # (D, 4H)
    whh_t = jnp.transpose(w_hh)               # (H, 4H)
    bias = (b_ih + b_hh).reshape(1, 4 * H)    # (1, 4H)

    out, (h_n, c_n) = lstm_forward(x, wih_t, whh_t, bias)
    jax.block_until_ready((out, h_n, c_n))

    ref_out, (ref_h, ref_c) = lstm_reference(x, w_ih, w_hh, b_ih, b_hh)
    assert out.shape == (T, B, H) and h_n.shape == (1, B, H) and c_n.shape == (1, B, H)
    assert jnp.allclose(out, ref_out, atol=1e-5, rtol=1e-5)
    assert jnp.allclose(h_n, ref_h, atol=1e-5, rtol=1e-5)
    assert jnp.allclose(c_n, ref_c, atol=1e-5, rtol=1e-5)

    print("KERNEL_OK")
</pallas_src>

<mosaic_0001>
module attributes {stable_mosaic.version = 11 : i64} {
  func.func @_lstm_kernel(%arg0: memref<16x16xf32, #tpu.memory_space<vmem>>, %arg1: memref<16x128xf32, #tpu.memory_space<vmem>>, %arg2: memref<32x128xf32, #tpu.memory_space<vmem>>, %arg3: memref<1x128xf32, #tpu.memory_space<vmem>>, %arg4: memref<8x2x32xf32, #tpu.memory_space<vmem>>, %arg5: memref<1x2x32xf32, #tpu.memory_space<vmem>>, %arg6: memref<1x2x32xf32, #tpu.memory_space<vmem>>) attributes {dimension_semantics = [], scalar_prefetch = 0 : i64, scratch_operands = 0 : i64, tpu.core_type = #tpu.core_type<tc>} {
    %c0 = arith.constant 0 : index
    %c0_0 = arith.constant 0 : index
    %0 = vector.load %arg0[%c0, %c0_0] : memref<16x16xf32, #tpu.memory_space<vmem>>, vector<16x16xf32>
    %c0_1 = arith.constant 0 : index
    %c0_2 = arith.constant 0 : index
    %1 = vector.load %arg1[%c0_1, %c0_2] : memref<16x128xf32, #tpu.memory_space<vmem>>, vector<16x128xf32>
    %cst = arith.constant dense<0.000000e+00> : vector<16x128xf32>
    %2 = tpu.matmul %0, %1, %cst {dimension_numbers = #tpu.dot_dimension_numbers<[1], [0], [0], [1], [0, 0, 1, 1], [], []>} : vector<16x16xf32>, vector<16x128xf32>, vector<16x128xf32> -> vector<16x128xf32>
    %c0_3 = arith.constant 0 : index
    %c0_4 = arith.constant 0 : index
    %3 = vector.load %arg3[%c0_3, %c0_4] : memref<1x128xf32, #tpu.memory_space<vmem>>, vector<1x128xf32>
    %4 = vector.broadcast %3 : vector<1x128xf32> to vector<16x128xf32>
    %5 = arith.addf %2, %4 : vector<16x128xf32>
    %c0_5 = arith.constant 0 : index
    %c0_6 = arith.constant 0 : index
    %6 = vector.load %arg2[%c0_5, %c0_6] : memref<32x128xf32, #tpu.memory_space<vmem>>, vector<32x128xf32>
    %cst_7 = arith.constant 0.000000e+00 : f32
    %7 = vector.broadcast %cst_7 : f32 to vector<2x32xf32>
    %cst_8 = arith.constant 0.000000e+00 : f32
    %8 = vector.broadcast %cst_8 : f32 to vector<2x32xf32>
    %9 = vector.extract_strided_slice %5 {offsets = [0, 0], sizes = [2, 128], strides = [1, 1]} : vector<16x128xf32> to vector<2x128xf32>
    %cst_9 = arith.constant dense<0.000000e+00> : vector<2x128xf32>
    %10 = tpu.matmul %7, %6, %cst_9 {dimension_numbers = #tpu.dot_dimension_numbers<[1], [0], [0], [1], [0, 0, 1, 1], [], []>} : vector<2x32xf32>, vector<32x128xf32>, vector<2x128xf32> -> vector<2x128xf32>
    %11 = arith.addf %9, %10 : vector<2x128xf32>
    %12 = arith.negf %11 : vector<2x128xf32>
    %13 = math.exp %12 : vector<2x128xf32>
    %cst_10 = arith.constant 1.000000e+00 : f32
    %14 = vector.broadcast %cst_10 : f32 to vector<2x128xf32>
    %15 = arith.addf %14, %13 : vector<2x128xf32>
    %16 = arith.divf %14, %15 : vector<2x128xf32>
    %17 = vector.extract_strided_slice %16 {offsets = [0, 0], sizes = [2, 32], strides = [1, 1]} : vector<2x128xf32> to vector<2x32xf32>
    %18 = vector.extract_strided_slice %16 {offsets = [0, 32], sizes = [2, 32], strides = [1, 1]} : vector<2x128xf32> to vector<2x32xf32>
    %19 = vector.extract_strided_slice %16 {offsets = [0, 96], sizes = [2, 32], strides = [1, 1]} : vector<2x128xf32> to vector<2x32xf32>
    %20 = vector.extract_strided_slice %11 {offsets = [0, 64], sizes = [2, 32], strides = [1, 1]} : vector<2x128xf32> to vector<2x32xf32>
    %21 = math.tanh %20 : vector<2x32xf32>
    %22 = arith.mulf %18, %8 : vector<2x32xf32>
    %23 = arith.mulf %17, %21 : vector<2x32xf32>
    %24 = arith.addf %22, %23 : vector<2x32xf32>
    %25 = math.tanh %24 : vector<2x32xf32>
    %26 = arith.mulf %19, %25 : vector<2x32xf32>
    %27 = vector.extract_strided_slice %5 {offsets = [2, 0], sizes = [2, 128], strides = [1, 1]} : vector<16x128xf32> to vector<2x128xf32>
    %cst_11 = arith.constant dense<0.000000e+00> : vector<2x128xf32>
    %28 = tpu.matmul %26, %6, %cst_11 {dimension_numbers = #tpu.dot_dimension_numbers<[1], [0], [0], [1], [0, 0, 1, 1], [], []>} : vector<2x32xf32>, vector<32x128xf32>, vector<2x128xf32> -> vector<2x128xf32>
    %29 = arith.addf %27, %28 : vector<2x128xf32>
    %30 = arith.negf %29 : vector<2x128xf32>
    %31 = math.exp %30 : vector<2x128xf32>
    %cst_12 = arith.constant 1.000000e+00 : f32
    %32 = vector.broadcast %cst_12 : f32 to vector<2x128xf32>
    %33 = arith.addf %32, %31 : vector<2x128xf32>
    %34 = arith.divf %32, %33 : vector<2x128xf32>
    %35 = vector.extract_strided_slice %34 {offsets = [0, 0], sizes = [2, 32], strides = [1, 1]} : vector<2x128xf32> to vector<2x32xf32>
    %36 = vector.extract_strided_slice %34 {offsets = [0, 32], sizes = [2, 32], strides = [1, 1]} : vector<2x128xf32> to vector<2x32xf32>
    %37 = vector.extract_strided_slice %34 {offsets = [0, 96], sizes = [2, 32], strides = [1, 1]} : vector<2x128xf32> to vector<2x32xf32>
    %38 = vector.extract_strided_slice %29 {offsets = [0, 64], sizes = [2, 32], strides = [1, 1]} : vector<2x128xf32> to vector<2x32xf32>
    %39 = math.tanh %38 : vector<2x32xf32>
    %40 = arith.mulf %36, %24 : vector<2x32xf32>
    %41 = arith.mulf %35, %39 : vector<2x32xf32>
    %42 = arith.addf %40, %41 : vector<2x32xf32>
    %43 = math.tanh %42 : vector<2x32xf32>
    %44 = arith.mulf %37, %43 : vector<2x32xf32>
    %45 = vector.extract_strided_slice %5 {offsets = [4, 0], sizes = [2, 128], strides = [1, 1]} : vector<16x128xf32> to vector<2x128xf32>
    %cst_13 = arith.constant dense<0.000000e+00> : vector<2x128xf32>
    %46 = tpu.matmul %44, %6, %cst_13 {dimension_numbers = #tpu.dot_dimension_numbers<[1], [0], [0], [1], [0, 0, 1, 1], [], []>} : vector<2x32xf32>, vector<32x128xf32>, vector<2x128xf32> -> vector<2x128xf32>
    %47 = arith.addf %45, %46 : vector<2x128xf32>
    %48 = arith.negf %47 : vector<2x128xf32>
    %49 = math.exp %48 : vector<2x128xf32>
    %cst_14 = arith.constant 1.000000e+00 : f32
    %50 = vector.broadcast %cst_14 : f32 to vector<2x128xf32>
    %51 = arith.addf %50, %49 : vector<2x128xf32>
    %52 = arith.divf %50, %51 : vector<2x128xf32>
    %53 = vector.extract_strided_slice %52 {offsets = [0, 0], sizes = [2, 32], strides = [1, 1]} : vector<2x128xf32> to vector<2x32xf32>
    %54 = vector.extract_strided_slice %52 {offsets = [0, 32], sizes = [2, 32], strides = [1, 1]} : vector<2x128xf32> to vector<2x32xf32>
    %55 = vector.extract_strided_slice %52 {offsets = [0, 96], sizes = [2, 32], strides = [1, 1]} : vector<2x128xf32> to vector<2x32xf32>
    %56 = vector.extract_strided_slice %47 {offsets = [0, 64], sizes = [2, 32], strides = [1, 1]} : vector<2x128xf32> to vector<2x32xf32>
    %57 = math.tanh %56 : vector<2x32xf32>
    %58 = arith.mulf %54, %42 : vector<2x32xf32>
    %59 = arith.mulf %53, %57 : vector<2x32xf32>
    %60 = arith.addf %58, %59 : vector<2x32xf32>
    %61 = math.tanh %60 : vector<2x32xf32>
    %62 = arith.mulf %55, %61 : vector<2x32xf32>
    %63 = vector.extract_strided_slice %5 {offsets = [6, 0], sizes = [2, 128], strides = [1, 1]} : vector<16x128xf32> to vector<2x128xf32>
    %cst_15 = arith.constant dense<0.000000e+00> : vector<2x128xf32>
    %64 = tpu.matmul %62, %6, %cst_15 {dimension_numbers = #tpu.dot_dimension_numbers<[1], [0], [0], [1], [0, 0, 1, 1], [], []>} : vector<2x32xf32>, vector<32x128xf32>, vector<2x128xf32> -> vector<2x128xf32>
    %65 = arith.addf %63, %64 : vector<2x128xf32>
    %66 = arith.negf %65 : vector<2x128xf32>
    %67 = math.exp %66 : vector<2x128xf32>
    %cst_16 = arith.constant 1.000000e+00 : f32
    %68 = vector.broadcast %cst_16 : f32 to vector<2x128xf32>
    %69 = arith.addf %68, %67 : vector<2x128xf32>
    %70 = arith.divf %68, %69 : vector<2x128xf32>
    %71 = vector.extract_strided_slice %70 {offsets = [0, 0], sizes = [2, 32], strides = [1, 1]} : vector<2x128xf32> to vector<2x32xf32>
    %72 = vector.extract_strided_slice %70 {offsets = [0, 32], sizes = [2, 32], strides = [1, 1]} : vector<2x128xf32> to vector<2x32xf32>
    %73 = vector.extract_strided_slice %70 {offsets = [0, 96], sizes = [2, 32], strides = [1, 1]} : vector<2x128xf32> to vector<2x32xf32>
    %74 = vector.extract_strided_slice %65 {offsets = [0, 64], sizes = [2, 32], strides = [1, 1]} : vector<2x128xf32> to vector<2x32xf32>
    %75 = math.tanh %74 : vector<2x32xf32>
    %76 = arith.mulf %72, %60 : vector<2x32xf32>
    %77 = arith.mulf %71, %75 : vector<2x32xf32>
    %78 = arith.addf %76, %77 : vector<2x32xf32>
    %79 = math.tanh %78 : vector<2x32xf32>
    %80 = arith.mulf %73, %79 : vector<2x32xf32>
    %81 = vector.extract_strided_slice %5 {offsets = [8, 0], sizes = [2, 128], strides = [1, 1]} : vector<16x128xf32> to vector<2x128xf32>
    %cst_17 = arith.constant dense<0.000000e+00> : vector<2x128xf32>
    %82 = tpu.matmul %80, %6, %cst_17 {dimension_numbers = #tpu.dot_dimension_numbers<[1], [0], [0], [1], [0, 0, 1, 1], [], []>} : vector<2x32xf32>, vector<32x128xf32>, vector<2x128xf32> -> vector<2x128xf32>
    %83 = arith.addf %81, %82 : vector<2x128xf32>
    %84 = arith.negf %83 : vector<2x128xf32>
    %85 = math.exp %84 : vector<2x128xf32>
    %cst_18 = arith.constant 1.000000e+00 : f32
    %86 = vector.broadcast %cst_18 : f32 to vector<2x128xf32>
    %87 = arith.addf %86, %85 : vector<2x128xf32>
    %88 = arith.divf %86, %87 : vector<2x128xf32>
    %89 = vector.extract_strided_slice %88 {offsets = [0, 0], sizes = [2, 32], strides = [1, 1]} : vector<2x128xf32> to vector<2x32xf32>
    %90 = vector.extract_strided_slice %88 {offsets = [0, 32], sizes = [2, 32], strides = [1, 1]} : vector<2x128xf32> to vector<2x32xf32>
    %91 = vector.extract_strided_slice %88 {offsets = [0, 96], sizes = [2, 32], strides = [1, 1]} : vector<2x128xf32> to vector<2x32xf32>
    %92 = vector.extract_strided_slice %83 {offsets = [0, 64], sizes = [2, 32], strides = [1, 1]} : vector<2x128xf32> to vector<2x32xf32>
    %93 = math.tanh %92 : vector<2x32xf32>
    %94 = arith.mulf %90, %78 : vector<2x32xf32>
    %95 = arith.mulf %89, %93 : vector<2x32xf32>
    %96 = arith.addf %94, %95 : vector<2x32xf32>
    %97 = math.tanh %96 : vector<2x32xf32>
    %98 = arith.mulf %91, %97 : vector<2x32xf32>
    %99 = vector.extract_strided_slice %5 {offsets = [10, 0], sizes = [2, 128], strides = [1, 1]} : vector<16x128xf32> to vector<2x128xf32>
    %cst_19 = arith.constant dense<0.000000e+00> : vector<2x128xf32>
    %100 = tpu.matmul %98, %6, %cst_19 {dimension_numbers = #tpu.dot_dimension_numbers<[1], [0], [0], [1], [0, 0, 1, 1], [], []>} : vector<2x32xf32>, vector<32x128xf32>, vector<2x128xf32> -> vector<2x128xf32>
    %101 = arith.addf %99, %100 : vector<2x128xf32>
    %102 = arith.negf %101 : vector<2x128xf32>
    %103 = math.exp %102 : vector<2x128xf32>
    %cst_20 = arith.constant 1.000000e+00 : f32
    %104 = vector.broadcast %cst_20 : f32 to vector<2x128xf32>
    %105 = arith.addf %104, %103 : vector<2x128xf32>
    %106 = arith.divf %104, %105 : vector<2x128xf32>
    %107 = vector.extract_strided_slice %106 {offsets = [0, 0], sizes = [2, 32], strides = [1, 1]} : vector<2x128xf32> to vector<2x32xf32>
    %108 = vector.extract_strided_slice %106 {offsets = [0, 32], sizes = [2, 32], strides = [1, 1]} : vector<2x128xf32> to vector<2x32xf32>
    %109 = vector.extract_strided_slice %106 {offsets = [0, 96], sizes = [2, 32], strides = [1, 1]} : vector<2x128xf32> to vector<2x32xf32>
    %110 = vector.extract_strided_slice %101 {offsets = [0, 64], sizes = [2, 32], strides = [1, 1]} : vector<2x128xf32> to vector<2x32xf32>
    %111 = math.tanh %110 : vector<2x32xf32>
    %112 = arith.mulf %108, %96 : vector<2x32xf32>
    %113 = arith.mulf %107, %111 : vector<2x32xf32>
    %114 = arith.addf %112, %113 : vector<2x32xf32>
    %115 = math.tanh %114 : vector<2x32xf32>
    %116 = arith.mulf %109, %115 : vector<2x32xf32>
    %117 = vector.extract_strided_slice %5 {offsets = [12, 0], sizes = [2, 128], strides = [1, 1]} : vector<16x128xf32> to vector<2x128xf32>
    %cst_21 = arith.constant dense<0.000000e+00> : vector<2x128xf32>
    %118 = tpu.matmul %116, %6, %cst_21 {dimension_numbers = #tpu.dot_dimension_numbers<[1], [0], [0], [1], [0, 0, 1, 1], [], []>} : vector<2x32xf32>, vector<32x128xf32>, vector<2x128xf32> -> vector<2x128xf32>
    %119 = arith.addf %117, %118 : vector<2x128xf32>
    %120 = arith.negf %119 : vector<2x128xf32>
    %121 = math.exp %120 : vector<2x128xf32>
    %cst_22 = arith.constant 1.000000e+00 : f32
    %122 = vector.broadcast %cst_22 : f32 to vector<2x128xf32>
    %123 = arith.addf %122, %121 : vector<2x128xf32>
    %124 = arith.divf %122, %123 : vector<2x128xf32>
    %125 = vector.extract_strided_slice %124 {offsets = [0, 0], sizes = [2, 32], strides = [1, 1]} : vector<2x128xf32> to vector<2x32xf32>
    %126 = vector.extract_strided_slice %124 {offsets = [0, 32], sizes = [2, 32], strides = [1, 1]} : vector<2x128xf32> to vector<2x32xf32>
    %127 = vector.extract_strided_slice %124 {offsets = [0, 96], sizes = [2, 32], strides = [1, 1]} : vector<2x128xf32> to vector<2x32xf32>
    %128 = vector.extract_strided_slice %119 {offsets = [0, 64], sizes = [2, 32], strides = [1, 1]} : vector<2x128xf32> to vector<2x32xf32>
    %129 = math.tanh %128 : vector<2x32xf32>
    %130 = arith.mulf %126, %114 : vector<2x32xf32>
    %131 = arith.mulf %125, %129 : vector<2x32xf32>
    %132 = arith.addf %130, %131 : vector<2x32xf32>
    %133 = math.tanh %132 : vector<2x32xf32>
    %134 = arith.mulf %127, %133 : vector<2x32xf32>
    %135 = vector.extract_strided_slice %5 {offsets = [14, 0], sizes = [2, 128], strides = [1, 1]} : vector<16x128xf32> to vector<2x128xf32>
    %cst_23 = arith.constant dense<0.000000e+00> : vector<2x128xf32>
    %136 = tpu.matmul %134, %6, %cst_23 {dimension_numbers = #tpu.dot_dimension_numbers<[1], [0], [0], [1], [0, 0, 1, 1], [], []>} : vector<2x32xf32>, vector<32x128xf32>, vector<2x128xf32> -> vector<2x128xf32>
    %137 = arith.addf %135, %136 : vector<2x128xf32>
    %138 = arith.negf %137 : vector<2x128xf32>
    %139 = math.exp %138 : vector<2x128xf32>
    %cst_24 = arith.constant 1.000000e+00 : f32
    %140 = vector.broadcast %cst_24 : f32 to vector<2x128xf32>
    %141 = arith.addf %140, %139 : vector<2x128xf32>
    %142 = arith.divf %140, %141 : vector<2x128xf32>
    %143 = vector.extract_strided_slice %142 {offsets = [0, 0], sizes = [2, 32], strides = [1, 1]} : vector<2x128xf32> to vector<2x32xf32>
    %144 = vector.extract_strided_slice %142 {offsets = [0, 32], sizes = [2, 32], strides = [1, 1]} : vector<2x128xf32> to vector<2x32xf32>
    %145 = vector.extract_strided_slice %142 {offsets = [0, 96], sizes = [2, 32], strides = [1, 1]} : vector<2x128xf32> to vector<2x32xf32>
    %146 = vector.extract_strided_slice %137 {offsets = [0, 64], sizes = [2, 32], strides = [1, 1]} : vector<2x128xf32> to vector<2x32xf32>
    %147 = math.tanh %146 : vector<2x32xf32>
    %148 = arith.mulf %144, %132 : vector<2x32xf32>
    %149 = arith.mulf %143, %147 : vector<2x32xf32>
    %150 = arith.addf %148, %149 : vector<2x32xf32>
    %151 = math.tanh %150 : vector<2x32xf32>
    %152 = arith.mulf %145, %151 : vector<2x32xf32>
    %153 = vector.shape_cast %26 : vector<2x32xf32> to vector<1x2x32xf32>
    %154 = vector.shape_cast %44 : vector<2x32xf32> to vector<1x2x32xf32>
    %155 = vector.shape_cast %62 : vector<2x32xf32> to vector<1x2x32xf32>
    %156 = vector.shape_cast %80 : vector<2x32xf32> to vector<1x2x32xf32>
    %157 = vector.shape_cast %98 : vector<2x32xf32> to vector<1x2x32xf32>
    %158 = vector.shape_cast %116 : vector<2x32xf32> to vector<1x2x32xf32>
    %159 = vector.shape_cast %134 : vector<2x32xf32> to vector<1x2x32xf32>
    %160 = vector.shape_cast %152 : vector<2x32xf32> to vector<1x2x32xf32>
    %161 = tpu.concatenate %153, %154, %155, %156, %157, %158, %159, %160 in 0 : vector<1x2x32xf32>, vector<1x2x32xf32>, vector<1x2x32xf32>, vector<1x2x32xf32>, vector<1x2x32xf32>, vector<1x2x32xf32>, vector<1x2x32xf32>, vector<1x2x32xf32> -> vector<8x2x32xf32>
    %c0_25 = arith.constant 0 : index
    %c0_26 = arith.constant 0 : index
    %c0_27 = arith.constant 0 : index
    %162 = vector.load %arg4[%c0_25, %c0_26, %c0_27] : memref<8x2x32xf32, #tpu.memory_space<vmem>>, vector<8x2x32xf32>
    tpu.vector_store %arg4[%c0_25, %c0_26, %c0_27], %161 {strides = array<i32>} : memref<8x2x32xf32, #tpu.memory_space<vmem>>, vector<8x2x32xf32>,
    %c0_28 = arith.constant 0 : index
    %c0_29 = arith.constant 0 : index
    %c0_30 = arith.constant 0 : index
    %163 = vector.load %arg5[%c0_28, %c0_29, %c0_30] : memref<1x2x32xf32, #tpu.memory_space<vmem>>, vector<1x2x32xf32>
    %164 = vector.shape_cast %163 : vector<1x2x32xf32> to vector<2x32xf32>
    %165 = vector.shape_cast %152 : vector<2x32xf32> to vector<1x2x32xf32>
    tpu.vector_store %arg5[%c0_28, %c0_29, %c0_30], %165 {strides = array<i32>} : memref<1x2x32xf32, #tpu.memory_space<vmem>>, vector<1x2x32xf32>,
    %c0_31 = arith.constant 0 : index
    %c0_32 = arith.constant 0 : index
    %c0_33 = arith.constant 0 : index
    %166 = vector.load %arg6[%c0_31, %c0_32, %c0_33] : memref<1x2x32xf32, #tpu.memory_space<vmem>>, vector<1x2x32xf32>
    %167 = vector.shape_cast %166 : vector<1x2x32xf32> to vector<2x32xf32>
    %168 = vector.shape_cast %150 : vector<2x32xf32> to vector<1x2x32xf32>
    tpu.vector_store %arg6[%c0_31, %c0_32, %c0_33], %168 {strides = array<i32>} : memref<1x2x32xf32, #tpu.memory_space<vmem>>, vector<1x2x32xf32>,
    return
  }
}

</mosaic_0001>

<bundles_post_ra>
// kernel: lstm_forward.1
= control target key start
LH: loop header
LB: loop body
LE: loop exit
PB: predicated region body
PF: predicated region fallthrough
CT: control target
= control target key end

     0   :  { %12 = vsyncpa [#allocation3], 0  ;;  %s1665_s0 = inlined_call_operand.hbm [shape: f32[16,16], index: 0, kind: input, shape index: {}]   ;;  %s1666_s1 = inlined_call_operand.hbm [shape: f32[16,128], index: 1, kind: input, shape index: {}]   ;;  %s1667_s2 = inlined_call_operand.hbm [shape: f32[32,128], index: 2, kind: input, shape index: {}]   ;;  %s1668_s3 = inlined_call_operand.vmem [shape: f32[1,128], index: 3, kind: input, shape index: {}]   ;;  %s1669_s4 = inlined_call_operand.hbm [shape: f32[8,2,32], index: 4, kind: output, shape index: {0}]   ;;  %s1670_s5 = inlined_call_operand.hbm [shape: f32[1,2,32], index: 5, kind: output, shape index: {1}]   ;;  %s1671_s6 = inlined_call_operand.hbm [shape: f32[1,2,32], index: 6, kind: output, shape index: {2}]  }
   0x1   :  { %13 = vsyncpa [#allocation6], 0 }
   0x2   :  { %14 = vsyncpa [#allocation4], 0 }
   0x3   :  { %15 = vsyncpa [#allocation10], 0  ;;  %s1442_s21 = smov [#allocation5]   ;;  %s1443_s23 = smov [#allocation2]  }
   0x4   :  { %s33_s22 = sshll.u32 %s1442_s21, 4  ;;  %s21_s24 = sshll.u32 %s1443_s23, 4  ;;  %s34_s22 = int_to_ptr.vmem [resolvable:$true] %s33_s22  ;;  %s22_s24 = int_to_ptr.vmem [resolvable:$true] %s21_s24 }
   0x5   :  { %s1322_s25 = scalar_lea.vmem %s34_s22, 256  ;;  %p1327_p1 = scmp.lt.s32.totalorder %s34_s22, %s34_s22 }
   0x6   :  { %p1323_p0 = scmp.ne.s32.totalorder %s34_s22, %s1322_s25  ;;  %p1328_p2 = scmp.lt.s32.totalorder %s1322_s25, %s1322_s25 }
   0x8   :  { %p1329_p3 = por %p1328_p2, %p1327_p1 }
   0xa   :  { %p1330_p4 = pnand %p1329_p3, %p1323_p0 }
   0xc   :  { %1333 = shalt.err (!%p1330_p4)
}
   0xd   :  { %s1444_s26 = smov 128   ;;  %s1445_s27 = smov 8  }
   0xe   :  { %39 = dma.hbm_to_vmem [thread:$0]  %s1666_s1, 256, %s34_s22, [#allocation6], %s1444_s26, %s1444_s26, %s1445_s27  }
   0xf   :  { %s1342_s30 = scalar_lea.vmem %s22_s24, 256  ;;  %p1347_p6 = scmp.lt.s32.totalorder %s22_s24, %s22_s24 }
  0x10   :  { %p1343_p5 = scmp.ne.s32.totalorder %s22_s24, %s1342_s30  ;;  %p1348_p7 = scmp.lt.s32.totalorder %s1342_s30, %s1342_s30 }
  0x12   :  { %p1349_p8 = por %p1348_p7, %p1347_p6 }
  0x14   :  { %p1350_p9 = pnand %p1349_p8, %p1343_p5 }
  0x16   :  { %1353 = shalt.err (!%p1350_p9)
}
  0x17   :  { %27 = dma.hbm_to_vmem [thread:$0]  %s1665_s0, 256, %s22_s24, [#allocation3], %s1444_s26, %s1444_s26, %s1445_s27  }
  0x18   :  { %s1446_s9 = smov [#allocation7]  }
  0x19   :  { %s45_s10 = sshll.u32 %s1446_s9, 4  ;;  %s46_s10 = int_to_ptr.vmem [resolvable:$true] %s45_s10 }
  0x1a   :  { %s1362_s11 = scalar_lea.vmem %s46_s10, 512  ;;  %p1367_p11 = scmp.lt.s32.totalorder %s46_s10, %s46_s10 }
  0x1b   :  { %p1363_p10 = scmp.ne.s32.totalorder %s46_s10, %s1362_s11  ;;  %p1368_p12 = scmp.lt.s32.totalorder %s1362_s11, %s1362_s11 }
  0x1d   :  { %p1369_p13 = por %p1368_p12, %p1367_p11 }
  0x1f   :  { %p1370_p0 = pnand %p1369_p13, %p1363_p10 }
  0x21   :  { %1373 = shalt.err (!%p1370_p0)
}
  0x22   :  { %51 = dma.hbm_to_vmem [thread:$0]  %s1667_s2, 512, %s46_s10, [#allocation6], %s1444_s26, %s1444_s26, %s1445_s27  }
  0x23   :  { %1434 = dma.done.wait [#allocation3], 256  }
  0x24   :  { %1435 = vsyncadd [#allocation3], 4294967040 }
  0x25   :  { %1436 = dma.done.wait [#allocation6], 768  }
  0x26   :  { %1437 = vsyncadd [#allocation6], 4294966528  ;;  %v1447_v0 = vmov 0.0   ;;  %vm1448_vm0 = vmmov 0   ;;  %v66_v1 = vld [vmem:[#allocation5 + $0x8] sm:$0xff]  ;;  %v65_v3 = vld [vmem:[#allocation5] sm:$0xff] }
  0x27   :  { %1148 = vmatprep.subr.mxu1 %v1447_v0  ;;  %1156 = vmatprep.mubr.msk.f32.mxu1 %vm1448_vm0, %v1447_v0  ;;  %v1503_v2 = vld [vmem:[#allocation7 + $0x18] sm:$0xff]  ;;  %v1506_v4 = vld [vmem:[#allocation7 + $0x10] sm:$0xff]  ;;  %v63_v5 = vld [vmem:[#allocation2] sm:$0xff]  ;;  %vm74_vm1 = vcmask 130048   ;;  %s1449_s13 = smov 64   ;;  %vm1015_vm2 = vcmask 254976  }
  0x28   :  { %1141 = vmatprep.subr.mxu0 %v66_v1  ;;  %1149 = vmatpush3.msra.mxu1 %v1503_v2  ;;  %v64_v6 = vld [vmem:[#allocation2 + $0x8] sm:$0xff]  ;;  %v1513_v8 = vld [vmem:[#allocation7] sm:$0xff]  ;;  %vm160_vm3 = vcmask 261120   ;;  %s1451_s14 = smov 96   ;;  %s1452_s15 = smov [#allocation9]   ;;  %vm1027_vm4 = vcmask 261126  }
  0x29   :  { %1142 = vmatpush3.msra.mxu0 %v66_v1  ;;  %1150 = vmatprep.subr.mxu1 %v1447_v0  ;;  %v1510_v7 = vld [vmem:[#allocation7 + $0x8] sm:$0xff]  ;;  %v1079_v9 = vld [vmem:[%s1668_s3] ss:$0 sm:$0xff]  ;;  %s1450_s3 = smov 32   ;;  %s1052_s16 = sshll.u32 %s1452_s15, 4  ;;  %s1053_s16 = int_to_ptr.vmem [resolvable:$true] %s1052_s16 }
  0x2a   :  { %1143 = vmatprep.subr.mxu0 %v65_v3  ;;  %1151 = vmatpush3.msra.mxu1 %v1506_v4  ;;  %s1453_s17 = smov [#allocation8]   ;;  %s1454_s19 = smov [#allocation11]  }
  0x2b   :  { %1144 = vmatpush3.msra.mxu0 %v65_v3  ;;  %1145 = vmatprep.mubr.msk.f32.mxu0 %vm74_vm1, %v63_v5  ;;  %s1039_s18 = sshll.u32 %s1453_s17, 4  ;;  %s1062_s20 = sshll.u32 %s1454_s19, 4  ;;  %s1040_s18 = int_to_ptr.vmem [resolvable:$true] %s1039_s18  ;;  %s1063_s20 = int_to_ptr.vmem [resolvable:$true] %s1062_s20 }
  0x2c   :  { %1152 = vmatprep.subr.mxu1 %v1447_v0  ;;  %1146 = vmatmul.mubr.msk.f32.vlgmr.msra.gmra.mxu0 %vm74_vm1, %v64_v6  ;;  %s1374_s21 = scalar_lea.vmem %s1053_s16, 32  ;;  %p1379_p2 = scmp.lt.s32.totalorder %s1053_s16, %s1053_s16 }
  0x2d   :  { %1153 = vmatpush3.msra.mxu1 %v1510_v7  ;;  %1159 = vmatprep.subr.mxu0 %v1447_v0  ;;  %p1375_p1 = scmp.ne.s32.totalorder %s1053_s16, %s1374_s21  ;;  %p1380_p3 = scmp.lt.s32.totalorder %s1374_s21, %s1374_s21 }
  0x2e   :  { %1154 = vmatprep.subr.mxu1 %v1447_v0  ;;  %1160 = vmatpush3.msra.mxu0 %v1503_v2 }
  0x2f   :  { %1155 = vmatpush3.msra.mxu1 %v1513_v8  ;;  %1161 = vmatprep.subr.mxu0 %v1447_v0  ;;  %p1381_p4 = por %p1380_p3, %p1379_p2 }
  0x30   :  { %1157 = vmatmul.mubr.f32.vlgmr.msra.gmra.mxu1 %v1447_v0  ;;  %1162 = vmatpush3.msra.mxu0 %v1506_v4 }
  0x31   :  { %1163 = vmatprep.subr.mxu0 %v1447_v0  ;;  %1167 = vmatprep.mubr.msk.f32.mxu0 %vm1448_vm0, %v1447_v0  ;;  %p1382_p5 = pnand %p1381_p4, %p1375_p1 }
  0x32   :  { %1164 = vmatpush3.msra.mxu0 %v1510_v7  ;;  %1170 = vmatprep.subr.mxu1 %v1447_v0 }
  0x33   :  { %1165 = vmatprep.subr.mxu0 %v1447_v0  ;;  %1171 = vmatpush3.msra.mxu1 %v1503_v2 }
  0x34   :  { %1166 = vmatpush3.msra.mxu0 %v1513_v8  ;;  %1172 = vmatprep.subr.mxu1 %v1447_v0 }
  0x35   :  { %1173 = vmatpush3.msra.mxu1 %v1506_v4  ;;  %1178 = vmatprep.mubr.msk.f32.mxu1 %vm1448_vm0, %v1447_v0 }
  0x36   :  { %1174 = vmatprep.subr.mxu1 %v1447_v0  ;;  %1181 = vmatprep.subr.mxu0 %v1447_v0 }
  0x37   :  { %1175 = vmatpush3.msra.mxu1 %v1510_v7 }
  0x38   :  { %1176 = vmatprep.subr.mxu1 %v1447_v0 }
  0x39   :  { %1177 = vmatpush3.msra.mxu1 %v1513_v8 }
  0x3a   :  { %1192 = vmatprep.subr.mxu1 %v1447_v0 }
  0xec   :  { %v1147_v10 = vpop.f32.mrf.mxu0 }
  0xed   :  { %v1544_v11 = vadd.f32 %v1147_v10, %v1079_v9 }
  0xee   :  { %v147_v12 = vpop.f32.mrf.mxu0 }
  0xef   :  { %v1546_v13 = vadd.f32 %v1079_v9, %v147_v12 }
  0xf0   :  { %v230_v14 = vpop.f32.mrf.mxu1 }
  0xf1   :  { %v234_v15 = vadd.f32 %v230_v14, %v1546_v13 }
  0xf2   :  { %v1158_v16 = vpop.f32.mrf.mxu1 }
  0xf3   :  { %1250 = vtanh.f32 %v234_v15  ;;  %v1082_v18 = vmul.f32 -1.442695, %v234_v15 }
  0xf5   :  { %1252 = vpow2.f32 %v1082_v18 }
 0x100   :  { %v1251_v17 = vpop.eup %1250 }
 0x101   :  { %244 = vrot.lane.b32.xlu0 %v1251_v17, %s1449_s13 }
 0x102   :  { %v1253_v19 = vpop.eup %1252 }
 0x103   :  { %v238_v20 = vadd.f32 1.0, %v1253_v19 }
 0x105   :  { %1254 = vrcp.f32 %v238_v20 }
 0x112   :  { %v1255_v21 = vpop.eup %1254 }
 0x113   :  { %v242_v24 = vmul.f32 0.0, %v1255_v21 }
 0x173   :  { %v245_v22 = vpop.permute.xlu0 %244 }
 0x174   :  { %v247_v23 = vmul.f32 %v1255_v21, %v245_v22 }
 0x176   :  { %249 = vrot.lane.b32.xlu0 %v247_v23, %s1450_s3 }
 0x1e8   :  { %v250_v25 = vpop.permute.xlu0 %249 }
 0x1e9   :  { %v252_v26 = vadd.f32 %v250_v25, %v242_v24 }
 0x1eb   :  { %1256 = vtanh.f32 %v252_v26  ;;  %v346_v42 = vrot.slane %v252_v26, 6 }
 0x1f8   :  { %v1257_v27 = vpop.eup %1256 }
 0x1f9   :  { %255 = vrot.lane.b32.xlu1 %v1257_v27, %s1449_s13 }
 0x26b   :  { %v256_v28 = vpop.permute.xlu1 %255 }
 0x26c   :  { %v258_v29 = vmul.f32 %v1255_v21, %v256_v28 }
 0x26e   :  { %260 = vrot.lane.b32.xlu1 %v258_v29, %s1450_s3 }
 0x2e0   :  { %v261_v30 = vpop.permute.xlu1 %260 }
 0x2e1   :  { %1016 = vst.msk [vmem:[#allocation8] sm:$0x3] %vm1015_vm2, %v261_v30  ;;  %1168 = vmatmul.mubr.msk.f32.vlgmr.msra.gmra.mxu0 %vm160_vm3, %v261_v30 }
 0x2e2   :  { %1182 = vmatpush3.msra.mxu0 %v1503_v2  ;;  %1189 = vmatprep.mubr.msk.f32.mxu0 %vm1448_vm0, %v1447_v0 }
 0x2e3   :  { %1183 = vmatprep.subr.mxu0 %v1447_v0 }
 0x2e4   :  { %1184 = vmatpush3.msra.mxu0 %v1506_v4 }
 0x2e5   :  { %1185 = vmatprep.subr.mxu0 %v1447_v0 }
 0x2e6   :  { %1186 = vmatpush3.msra.mxu0 %v1510_v7 }
 0x2e7   :  { %1187 = vmatprep.subr.mxu0 %v1447_v0 }
 0x2e8   :  { %1188 = vmatpush3.msra.mxu0 %v1513_v8 }
 0x2e9   :  { %1203 = vmatprep.subr.mxu0 %v1447_v0 }
 0x3a1   :  { %v330_v31 = vpop.f32.mrf.mxu0 }
 0x3a2   :  { %v335_v32 = vrot.slane %v330_v31, 6 }
 0x3a3   :  { %v1169_v33 = vpop.f32.mrf.mxu0 }
 0x3a4   :  { %v337_v34 = vadd.f32 %v335_v32, %v1546_v13 }
 0x3a6   :  { %1258 = vtanh.f32 %v337_v34  ;;  %v1084_v36 = vmul.f32 -1.442695, %v337_v34 }
 0x3a8   :  { %1260 = vpow2.f32 %v1084_v36 }
 0x3b3   :  { %v1259_v35 = vpop.eup %1258 }
 0x3b4   :  { %350 = vrot.lane.b32.xlu0 %v1259_v35, %s1449_s13 }
 0x3b5   :  { %v1261_v37 = vpop.eup %1260 }
 0x3b6   :  { %v341_v38 = vadd.f32 1.0, %v1261_v37 }
 0x3b8   :  { %1262 = vrcp.f32 %v341_v38 }
 0x3c5   :  { %v1263_v39 = vpop.eup %1262 }
 0x3c6   :  { %v348_v43 = vmul.f32 %v1263_v39, %v346_v42 }
 0x426   :  { %v351_v40 = vpop.permute.xlu0 %350 }
 0x427   :  { %v353_v41 = vmul.f32 %v1263_v39, %v351_v40 }
 0x429   :  { %355 = vrot.lane.b32.xlu1 %v353_v41, %s1450_s3 }
 0x49b   :  { %v356_v44 = vpop.permute.xlu1 %355 }
 0x49c   :  { %v358_v45 = vadd.f32 %v356_v44, %v348_v43 }
 0x49e   :  { %1264 = vtanh.f32 %v358_v45  ;;  %v453_v62 = vrot.slane %v358_v45, 6 }
 0x4ab   :  { %v1265_v46 = vpop.eup %1264 }
 0x4ac   :  { %361 = vrot.lane.b32.xlu0 %v1265_v46, %s1449_s13 }
 0x51e   :  { %v362_v47 = vpop.permute.xlu0 %361 }
 0x51f   :  { %v364_v48 = vmul.f32 %v1263_v39, %v362_v47 }
 0x521   :  { %v366_v49 = vrot.slane %v364_v48, 2 }
 0x523   :  { %367 = vrot.lane.b32.xlu1 %v366_v49, %s1450_s3 }
 0x595   :  { %v368_v50 = vpop.permute.xlu1 %367 }
 0x596   :  { %1017 = vst.msk [vmem:[#allocation8 + $0x2] sm:$0x3] %vm1015_vm2, %v368_v50  ;;  %1179 = vmatmul.mubr.msk.f32.vlgmr.msra.gmra.mxu1 %vm160_vm3, %v368_v50 }
 0x597   :  { %1193 = vmatpush3.msra.mxu1 %v1503_v2  ;;  %1200 = vmatprep.mubr.msk.f32.mxu1 %vm1448_vm0, %v1447_v0 }
 0x598   :  { %1194 = vmatprep.subr.mxu1 %v1447_v0 }
 0x599   :  { %1195 = vmatpush3.msra.mxu1 %v1506_v4 }
 0x59a   :  { %1196 = vmatprep.subr.mxu1 %v1447_v0 }
 0x59b   :  { %1197 = vmatpush3.msra.mxu1 %v1510_v7 }
 0x59c   :  { %1198 = vmatprep.subr.mxu1 %v1447_v0 }
 0x59d   :  { %1199 = vmatpush3.msra.mxu1 %v1513_v8 }
 0x59e   :  { %1214 = vmatprep.subr.mxu1 %v1447_v0 }
 0x656   :  { %v437_v51 = vpop.f32.mrf.mxu1 }
 0x657   :  { %v442_v52 = vrot.slane %v437_v51, 4 }
 0x658   :  { %v1180_v53 = vpop.f32.mrf.mxu1 }
 0x659   :  { %v444_v54 = vadd.f32 %v442_v52, %v1546_v13 }
 0x65b   :  { %1266 = vtanh.f32 %v444_v54  ;;  %v1086_v56 = vmul.f32 -1.442695, %v444_v54 }
 0x65d   :  { %1268 = vpow2.f32 %v1086_v56 }
 0x668   :  { %v1267_v55 = vpop.eup %1266 }
 0x669   :  { %457 = vrot.lane.b32.xlu0 %v1267_v55, %s1449_s13 }
 0x66a   :  { %v1269_v57 = vpop.eup %1268 }
 0x66b   :  { %v448_v58 = vadd.f32 1.0, %v1269_v57 }
 0x66d   :  { %1270 = vrcp.f32 %v448_v58 }
 0x67a   :  { %v1271_v59 = vpop.eup %1270 }
 0x67b   :  { %v455_v63 = vmul.f32 %v1271_v59, %v453_v62 }
 0x6db   :  { %v458_v60 = vpop.permute.xlu0 %457 }
 0x6dc   :  { %v460_v61 = vmul.f32 %v1271_v59, %v458_v60 }
 0x6de   :  { %462 = vrot.lane.b32.xlu1 %v460_v61, %s1450_s3 }
 0x750   :  { %v463_v1 = vpop.permute.xlu1 %462 }
 0x751   :  { %v465_v3 = vadd.f32 %v463_v1, %v455_v63 }
 0x753   :  { %1272 = vtanh.f32 %v465_v3  ;;  %v560_v25 = vrot.slane %v465_v3, 6 }
 0x760   :  { %v1273_v5 = vpop.eup %1272 }
 0x761   :  { %468 = vrot.lane.b32.xlu0 %v1273_v5, %s1449_s13 }
 0x7d3   :  { %v469_v6 = vpop.permute.xlu0 %468 }
 0x7d4   :  { %v471_v9 = vmul.f32 %v1271_v59, %v469_v6 }
 0x7d6   :  { %v473_v10 = vrot.slane %v471_v9, 4 }
 0x7d8   :  { %474 = vrot.lane.b32.xlu1 %v473_v10, %s1450_s3 }
 0x84a   :  { %v475_v12 = vpop.permute.xlu1 %474 }
 0x84b   :  { %1018 = vst.msk [vmem:[#allocation8 + $0x4] sm:$0x3] %vm1015_vm2, %v475_v12  ;;  %1190 = vmatmul.mubr.msk.f32.vlgmr.msra.gmra.mxu0 %vm160_vm3, %v475_v12 }
 0x84c   :  { %1204 = vmatpush3.msra.mxu0 %v1503_v2  ;;  %1211 = vmatprep.mubr.msk.f32.mxu0 %vm1448_vm0, %v1447_v0 }
 0x84d   :  { %1205 = vmatprep.subr.mxu0 %v1447_v0 }
 0x84e   :  { %1206 = vmatpush3.msra.mxu0 %v1506_v4 }
 0x84f   :  { %1207 = vmatprep.subr.mxu0 %v1447_v0 }
 0x850   :  { %1208 = vmatpush3.msra.mxu0 %v1510_v7 }
 0x851   :  { %1209 = vmatprep.subr.mxu0 %v1447_v0 }
 0x852   :  { %1210 = vmatpush3.msra.mxu0 %v1513_v8 }
 0x853   :  { %1225 = vmatprep.subr.mxu0 %v1447_v0 }
 0x90b   :  { %v544_v14 = vpop.f32.mrf.mxu0 }
 0x90c   :  { %v549_v15 = vrot.slane %v544_v14, 2 }
 0x90d   :  { %v1191_v16 = vpop.f32.mrf.mxu0 }
 0x90e   :  { %v551_v17 = vadd.f32 %v549_v15, %v1546_v13 }
 0x910   :  { %1274 = vtanh.f32 %v551_v17  ;;  %v1088_v19 = vmul.f32 -1.442695, %v551_v17 }
 0x912   :  { %1276 = vpow2.f32 %v1088_v19 }
 0x91d   :  { %v1275_v18 = vpop.eup %1274 }
 0x91e   :  { %564 = vrot.lane.b32.xlu0 %v1275_v18, %s1449_s13 }
 0x91f   :  { %v1277_v20 = vpop.eup %1276 }
 0x920   :  { %v555_v21 = vadd.f32 1.0, %v1277_v20 }
 0x922   :  { %1278 = vrcp.f32 %v555_v21 }
 0x92f   :  { %v1279_v22 = vpop.eup %1278 }
 0x930   :  { %v562_v26 = vmul.f32 %v1279_v22, %v560_v25 }
 0x990   :  { %v565_v23 = vpop.permute.xlu0 %564 }
 0x991   :  { %v567_v24 = vmul.f32 %v1279_v22, %v565_v23 }
 0x993   :  { %569 = vrot.lane.b32.xlu1 %v567_v24, %s1450_s3 }
 0xa05   :  { %v570_v27 = vpop.permute.xlu1 %569 }
 0xa06   :  { %v572_v28 = vadd.f32 %v570_v27, %v562_v26 }
 0xa08   :  { %1280 = vtanh.f32 %v572_v28  ;;  %v664_v43 = vrot.slane %v572_v28, 6 }
 0xa15   :  { %v1281_v13 = vpop.eup %1280 }
 0xa16   :  { %575 = vrot.lane.b32.xlu0 %v1281_v13, %s1449_s13 }
 0xa88   :  { %v576_v29 = vpop.permute.xlu0 %575 }
 0xa89   :  { %v578_v30 = vmul.f32 %v1279_v22, %v576_v29 }
 0xa8b   :  { %v580_v31 = vrot.slane %v578_v30, 6 }
 0xa8d   :  { %581 = vrot.lane.b32.xlu1 %v580_v31, %s1450_s3 }
 0xaff   :  { %v582_v32 = vpop.permute.xlu1 %581 }
 0xb00   :  { %1019 = vst.msk [vmem:[#allocation8 + $0x6] sm:$0x3] %vm1015_vm2, %v582_v32  ;;  %1201 = vmatmul.mubr.msk.f32.vlgmr.msra.gmra.mxu1 %vm160_vm3, %v582_v32 }
 0xb01   :  { %1215 = vmatpush3.msra.mxu1 %v1503_v2  ;;  %1222 = vmatprep.mubr.msk.f32.mxu1 %vm1448_vm0, %v1447_v0 }
 0xb02   :  { %1216 = vmatprep.subr.mxu1 %v1447_v0 }
 0xb03   :  { %1217 = vmatpush3.msra.mxu1 %v1506_v4 }
 0xb04   :  { %1218 = vmatprep.subr.mxu1 %v1447_v0 }
 0xb05   :  { %1219 = vmatpush3.msra.mxu1 %v1510_v7 }
 0xb06   :  { %1220 = vmatprep.subr.mxu1 %v1447_v0 }
 0xb07   :  { %1221 = vmatpush3.msra.mxu1 %v1513_v8 }
 0xbc0   :  { %v651_v33 = vpop.f32.mrf.mxu1 }
 0xbc1   :  { %v655_v34 = vadd.f32 %v651_v33, %v1544_v11 }
 0xbc2   :  { %v1202_v35 = vpop.f32.mrf.mxu1 }
 0xbc3   :  { %1282 = vtanh.f32 %v655_v34  ;;  %v1090_v37 = vmul.f32 -1.442695, %v655_v34 }
 0xbc5   :  { %1284 = vpow2.f32 %v1090_v37 }
 0xbd0   :  { %v1283_v36 = vpop.eup %1282 }
 0xbd1   :  { %668 = vrot.lane.b32.xlu0 %v1283_v36, %s1449_s13 }
 0xbd2   :  { %v1285_v38 = vpop.eup %1284 }
 0xbd3   :  { %v659_v39 = vadd.f32 1.0, %v1285_v38 }
 0xbd5   :  { %1286 = vrcp.f32 %v659_v39 }
 0xbe2   :  { %v1287_v40 = vpop.eup %1286 }
 0xbe3   :  { %v666_v44 = vmul.f32 %v1287_v40, %v664_v43 }
 0xc43   :  { %v669_v41 = vpop.permute.xlu0 %668 }
 0xc44   :  { %v671_v42 = vmul.f32 %v1287_v40, %v669_v41 }
 0xc46   :  { %673 = vrot.lane.b32.xlu1 %v671_v42, %s1450_s3 }
 0xcb8   :  { %v674_v45 = vpop.permute.xlu1 %673 }
 0xcb9   :  { %v676_v46 = vadd.f32 %v674_v45, %v666_v44 }
 0xcbb   :  { %1288 = vtanh.f32 %v676_v46 }
 0xcc8   :  { %v1289_v47 = vpop.eup %1288 }
 0xcc9   :  { %679 = vrot.lane.b32.xlu0 %v1289_v47, %s1449_s13 }
 0xd3b   :  { %v680_v48 = vpop.permute.xlu0 %679 }
 0xd3c   :  { %v682_v49 = vmul.f32 %v1287_v40, %v680_v48 }
 0xd3e   :  { %684 = vrot.lane.b32.xlu1 %v682_v49, %s1450_s3 }
 0xdb0   :  { %v685_v50 = vpop.permute.xlu1 %684 }
 0xdb1   :  { %1020 = vst.msk [vmem:[#allocation8 + $0x8] sm:$0x3] %vm1015_vm2, %v685_v50  ;;  %1212 = vmatmul.mubr.msk.f32.vlgmr.msra.gmra.mxu0 %vm160_vm3, %v685_v50 }
 0xdb2   :  { %1226 = vmatpush3.msra.mxu0 %v1503_v2  ;;  %1233 = vmatprep.mubr.msk.f32.mxu0 %vm1448_vm0, %v1447_v0 }
 0xdb3   :  { %1227 = vmatprep.subr.mxu0 %v1447_v0 }
 0xdb4   :  { %1228 = vmatpush3.msra.mxu0 %v1506_v4 }
 0xdb5   :  { %1229 = vmatprep.subr.mxu0 %v1447_v0 }
 0xdb6   :  { %1230 = vmatpush3.msra.mxu0 %v1510_v7 }
 0xdb7   :  { %1231 = vmatprep.subr.mxu0 %v1447_v0  ;;  %v770_v0 = vrot.slane %v676_v46, 6 }
 0xdb8   :  { %1232 = vmatpush3.msra.mxu0 %v1513_v8 }
 0xe71   :  { %v754_v51 = vpop.f32.mrf.mxu0 }
 0xe72   :  { %v759_v52 = vrot.slane %v754_v51, 6 }
 0xe73   :  { %v1213_v53 = vpop.f32.mrf.mxu0 }
 0xe74   :  { %v761_v2 = vadd.f32 %v759_v52, %v1544_v11 }
 0xe76   :  { %1290 = vtanh.f32 %v761_v2  ;;  %v1092_v55 = vmul.f32 -1.442695, %v761_v2 }
 0xe78   :  { %1292 = vpow2.f32 %v1092_v55 }
 0xe83   :  { %v1291_v54 = vpop.eup %1290 }
 0xe84   :  { %774 = vrot.lane.b32.xlu0 %v1291_v54, %s1449_s13 }
 0xe85   :  { %v1293_v4 = vpop.eup %1292 }
 0xe86   :  { %v765_v56 = vadd.f32 1.0, %v1293_v4 }
 0xe88   :  { %1294 = vrcp.f32 %v765_v56 }
 0xe95   :  { %v1295_v57 = vpop.eup %1294 }
 0xe96   :  { %v772_v8 = vmul.f32 %v1295_v57, %v770_v0 }
 0xef6   :  { %v775_v7 = vpop.permute.xlu0 %774 }
 0xef7   :  { %v777_v58 = vmul.f32 %v1295_v57, %v775_v7 }
 0xef9   :  { %779 = vrot.lane.b32.xlu1 %v777_v58, %s1450_s3 }
 0xf6b   :  { %v780_v59 = vpop.permute.xlu1 %779 }
 0xf6c   :  { %v782_v60 = vadd.f32 %v780_v59, %v772_v8 }
 0xf6e   :  { %1296 = vtanh.f32 %v782_v60  ;;  %v877_v20 = vrot.slane %v782_v60, 6 }
 0xf7b   :  { %v1297_v61 = vpop.eup %1296 }
 0xf7c   :  { %785 = vrot.lane.b32.xlu0 %v1297_v61, %s1449_s13 }
 0xfee   :  { %v786_v62 = vpop.permute.xlu0 %785 }
 0xfef   :  { %v788_v63 = vmul.f32 %v1295_v57, %v786_v62 }
 0xff1   :  { %v790_v1 = vrot.slane %v788_v63, 2 }
 0xff3   :  { %791 = vrot.lane.b32.xlu1 %v790_v1, %s1450_s3 }
0x1065   :  { %v792_v3 = vpop.permute.xlu1 %791 }
0x1066   :  { %1021 = vst.msk [vmem:[#allocation8 + $0xa] sm:$0x3] %vm1015_vm2, %v792_v3  ;;  %1223 = vmatmul.mubr.msk.f32.vlgmr.msra.gmra.mxu1 %vm160_vm3, %v792_v3 }
0x1126   :  { %v861_v5 = vpop.f32.mrf.mxu1 }
0x1127   :  { %v866_v6 = vrot.slane %v861_v5, 4 }
0x1128   :  { %v1224_v9 = vpop.f32.mrf.mxu1 }
0x1129   :  { %v868_v10 = vadd.f32 %v866_v6, %v1544_v11 }
0x112b   :  { %1298 = vtanh.f32 %v868_v10  ;;  %v1094_v14 = vmul.f32 -1.442695, %v868_v10 }
0x112d   :  { %1300 = vpow2.f32 %v1094_v14 }
0x1138   :  { %v1299_v12 = vpop.eup %1298 }
0x1139   :  { %881 = vrot.lane.b32.xlu0 %v1299_v12, %s1449_s13 }
0x113a   :  { %v1301_v15 = vpop.eup %1300 }
0x113b   :  { %v872_v16 = vadd.f32 1.0, %v1301_v15 }
0x113d   :  { %1302 = vrcp.f32 %v872_v16 }
0x114a   :  { %v1303_v17 = vpop.eup %1302 }
0x114b   :  { %v879_v21 = vmul.f32 %v1303_v17, %v877_v20 }
0x11ab   :  { %v882_v18 = vpop.permute.xlu0 %881 }
0x11ac   :  { %v884_v19 = vmul.f32 %v1303_v17, %v882_v18 }
0x11ae   :  { %886 = vrot.lane.b32.xlu1 %v884_v19, %s1450_s3 }
0x1220   :  { %v887_v22 = vpop.permute.xlu1 %886 }
0x1221   :  { %v889_v23 = vadd.f32 %v887_v22, %v879_v21 }
0x1223   :  { %1304 = vtanh.f32 %v889_v23  ;;  %v984_v39 = vrot.slane %v889_v23, 6 }
0x1230   :  { %v1305_v24 = vpop.eup %1304 }
0x1231   :  { %892 = vrot.lane.b32.xlu0 %v1305_v24, %s1449_s13 }
0x12a3   :  { %v893_v25 = vpop.permute.xlu0 %892 }
0x12a4   :  { %v895_v26 = vmul.f32 %v1303_v17, %v893_v25 }
0x12a6   :  { %v897_v27 = vrot.slane %v895_v26, 4 }
0x12a8   :  { %898 = vrot.lane.b32.xlu1 %v897_v27, %s1450_s3 }
0x131a   :  { %v899_v28 = vpop.permute.xlu1 %898 }
0x131b   :  { %1022 = vst.msk [vmem:[#allocation8 + $0xc] sm:$0x3] %vm1015_vm2, %v899_v28  ;;  %1234 = vmatmul.mubr.msk.f32.vlgmr.msra.gmra.mxu0 %vm160_vm3, %v899_v28 }
0x13db   :  { %v968_v13 = vpop.f32.mrf.mxu0 }
0x13dc   :  { %v973_v29 = vrot.slane %v968_v13, 2 }
0x13dd   :  { %v1235_v30 = vpop.f32.mrf.mxu0 }
0x13de   :  { %v975_v31 = vadd.f32 %v973_v29, %v1544_v11 }
0x13e0   :  { %1306 = vtanh.f32 %v975_v31  ;;  %v1096_v33 = vmul.f32 -1.442695, %v975_v31 }
0x13e2   :  { %1308 = vpow2.f32 %v1096_v33 }
0x13ed   :  { %v1307_v32 = vpop.eup %1306 }
0x13ee   :  { %988 = vrot.lane.b32.xlu0 %v1307_v32, %s1449_s13 }
0x13ef   :  { %v1309_v34 = vpop.eup %1308 }
0x13f0   :  { %v979_v35 = vadd.f32 1.0, %v1309_v34 }
0x13f2   :  { %1310 = vrcp.f32 %v979_v35 }
0x13ff   :  { %v1311_v36 = vpop.eup %1310 }
0x1400   :  { %v986_v40 = vmul.f32 %v1311_v36, %v984_v39 }
0x1460   :  { %v989_v37 = vpop.permute.xlu0 %988 }
0x1461   :  { %v991_v38 = vmul.f32 %v1311_v36, %v989_v37 }
0x1463   :  { %993 = vrot.lane.b32.xlu1 %v991_v38, %s1450_s3 }
0x14d5   :  { %v994_v41 = vpop.permute.xlu1 %993 }
0x14d6   :  { %v996_v42 = vadd.f32 %v994_v41, %v986_v40 }
0x14d8   :  { %1312 = vtanh.f32 %v996_v42 }
0x14e5   :  { %v1313_v11 = vpop.eup %1312 }
0x14e6   :  { %999 = vrot.lane.b32.xlu0 %v1313_v11, %s1449_s13 }
0x1558   :  { %v1000_v43 = vpop.permute.xlu0 %999 }
0x1559   :  { %v1002_v44 = vmul.f32 %v1311_v36, %v1000_v43 }
0x155b   :  { %v1004_v45 = vrot.slane %v1002_v44, 6  ;;  %1024 = vrot.lane.b32.xlu1 %v1002_v44, %s1450_s3 }
0x155d   :  { %1005 = vrot.lane.b32.xlu0 %v1004_v45, %s1450_s3 }
0x155f   :  { %1030 = vrot.lane.b32.xlu1 %v996_v42, %s1451_s14 }
0x15cd   :  { %v1025_v46 = vpop.permute.xlu1 %1024 }
0x15ce   :  { %1028 = vst.msk [vmem:[#allocation9 - $0x6] sm:$0xc0] %vm1027_vm4, %v1025_v46 }
0x15cf   :  { %v1006_v47 = vpop.permute.xlu0 %1005 }
0x15d0   :  { %1385 = shalt.err (!%p1382_p5)
}
0x15d1   :  { %1055 = dma.vmem_to_hbm [thread:$0]  %s1053_s16, 32, %s1670_s5, [#allocation10]   ;;  %1023 = vst.msk [vmem:[#allocation8 + $0xe] sm:$0x3] %vm1015_vm2, %v1006_v47  ;;  %v1031_v48 = vpop.permute.xlu1 %1030 }
0x15d2   :  { %s1394_s24 = scalar_lea.vmem %s1040_s18, 256  ;;  %p1399_p7 = scmp.lt.s32.totalorder %s1040_s18, %s1040_s18 }
0x15d3   :  { %p1395_p6 = scmp.ne.s32.totalorder %s1040_s18, %s1394_s24  ;;  %p1400_p8 = scmp.lt.s32.totalorder %s1394_s24, %s1394_s24 }
0x15d5   :  { %p1401_p9 = por %p1400_p8, %p1399_p7 }
0x15d7   :  { %p1402_p10 = pnand %p1401_p9, %p1395_p6 }
0x15d9   :  { %1405 = shalt.err (!%p1402_p10)
}
0x15da   :  { %s1455_s25 = smov 2   ;;  %1033 = vst.msk [vmem:[#allocation11 - $0x6] sm:$0xc0] %vm1027_vm4, %v1031_v48  ;;  %s1414_s5 = scalar_lea.vmem %s1063_s20, 32 }
0x15db   :  { %1045 = dma.vmem_to_hbm [thread:$0]  %s1040_s18, 256, %s1669_s4, [#allocation4], %s1450_s3, %s1450_s3, %s1455_s25  }
0x15dc   :  { %p1415_p11 = scmp.ne.s32.totalorder %s1063_s20, %s1414_s5  ;;  %p1419_p12 = scmp.lt.s32.totalorder %s1063_s20, %s1063_s20 }
0x15dd   :  { %p1420_p13 = scmp.lt.s32.totalorder %s1414_s5, %s1414_s5 }
0x15df   :  { %p1421_p0 = por %p1420_p13, %p1419_p12 }
0x15e1   :  { %p1422_p1 = pnand %p1421_p0, %p1415_p11 }
0x15e3   :  { %1425 = shalt.err (!%p1422_p1)
}
0x15e4   :  { %1065 = dma.vmem_to_hbm [thread:$0]  %s1063_s20, 32, %s1671_s6, [#allocation10]  }
0x15e5   :  { %1438 = dma.done.wait [#allocation4], 256  }
0x15e6   :  { %1439 = vsyncadd [#allocation4], 4294967040 }
0x15e7   :  { %1440 = dma.done.wait [#allocation10], 64  }
0x15e8   :  { %1441 = vsyncadd [#allocation10], 4294967232 }
0x15e9   :  { %1075 = vsyncpa [#allocation3], 1 }
0x15ea   :  { %1076 = vsyncpa [#allocation6], 1 }
0x15eb   :  { %1077 = vsyncpa [#allocation4], 1 }
0x15ec   :  { %1078 = vsyncpa [#allocation10], 1 }

</bundles_post_ra>
